<compile_context>
chip_gen: v7x
topology: tpu7x:2x2x1
jax: 0.10.0
libtpu: 0.0.40
codegen_flags: <defaults>
</compile_context>

<pallas_src>
import functools

import jax
import jax.numpy as jnp
from jax.experimental import pallas as pl
from jax.experimental.pallas import tpu as pltpu

TM_CAP = 512      # aggregation row tile cap (keeps >= 2 parallel i-steps on v7x for real graphs)
TK_CAP = 2048     # aggregation reduction tile cap (512 x 2048 bf16 A tile = 2 MiB)
TM1_CAP = 2048    # pre-mp (overhead-bound) row tile cap


def _round_up(x: int, m: int) -> int:
    return (x + m - 1) // m * m


def _prelu(x, alpha):
    return jnp.where(x >= 0, x, alpha * x)


def _divisor_tile(n_pad: int, cap: int) -> int:
    """Largest multiple of 128 that divides n_pad and is <= cap."""
    m = n_pad // 128
    best = 1
    for d in range(1, m + 1):
        if m % d == 0 and d * 128 <= cap:
            best = d
    return best * 128


def _plan_node_tiling(n: int):
    """Pick (n_pad, tm, tk): minimal A-bytes + per-step overhead, tiles dividing n_pad."""
    base = _round_up(max(n, 1), 128)
    best = None
    for extra in range(0, 8):                       # allow up to 7 * 128 extra padded rows
        n_pad = base + extra * 128
        tk = _divisor_tile(n_pad, TK_CAP)
        tm = _divisor_tile(n_pad, TM_CAP)
        steps = (n_pad // tm) * (n_pad // tk)
        # cost model: A streamed twice (K2 + K3) in bf16  +  ~0.35 us fixed per grid step
        cost = 2 * n_pad * n_pad * 2 + steps * 350_000
        if best is None or cost < best[0]:
            best = (cost, n_pad, tm, tk)
    _, n_pad, tm, tk = best
    return n_pad, tm, tk


# ----------------------------------------------------------------------------------------------
# Kernels
# ----------------------------------------------------------------------------------------------
def premp_kernel(h0_ref, w_pre_ref, b_pre_ref, w_mp0_ref, alpha_ref, out_ref):
    """z0 = PReLU(h0 @ W_pre + b_pre) @ W_mp0   (pre_mp + mp_layer0 node transform)."""
    f32 = jnp.float32
    h1 = _prelu(
        jnp.dot(h0_ref[...], w_pre_ref[...], preferred_element_type=f32) + b_pre_ref[...],
        alpha_ref[0])
    out_ref[...] = jnp.dot(h1.astype(w_mp0_ref.dtype), w_mp0_ref[...],
                           preferred_element_type=f32).astype(out_ref.dtype)


def mp_agg_kernel(*refs, alpha_idx: int, apply_w_next: bool, tk: int):
    """acc[i] = sum_k A[i,k] @ Xw[k];  out[i] = PReLU(acc + b) (@ W_next if requested).

    Xw is a single VMEM-resident block (constant index map); the k-slab is sliced in-kernel.
    """
    if apply_w_next:
        a_ref, xw_ref, b_ref, w_next_ref, alpha_ref, out_ref, acc_ref = refs
    else:
        a_ref, xw_ref, b_ref, alpha_ref, out_ref, acc_ref = refs
        w_next_ref = None

    k = pl.program_id(1)

    @pl.when(k == 0)
    def _():
        acc_ref[...] = jnp.zeros_like(acc_ref)

    row0 = pl.multiple_of(k * tk, 128)
    xw_k = xw_ref[pl.ds(row0, tk), :]
    acc_ref[...] += jnp.dot(a_ref[...], xw_k, preferred_element_type=jnp.float32)

    @pl.when(k == pl.num_programs(1) - 1)
    def _():
        h = _prelu(acc_ref[...] + b_ref[...], alpha_ref[alpha_idx])
        if apply_w_next:
            h = jnp.dot(h.astype(w_next_ref.dtype), w_next_ref[...],
                        preferred_element_type=jnp.float32)
        out_ref[...] = h.astype(out_ref.dtype)


def pool_head_kernel(p_ref, h_ref, w_head_ref, b_head_ref, out_ref, acc_ref):
    """graph_emb = P @ H3;  out = graph_emb @ W_head + b_head   (GraphHead, 1-layer MLP)."""
    k = pl.program_id(0)

    @pl.when(k == 0)
    def _():
        acc_ref[...] = jnp.zeros_like(acc_ref)

    acc_ref[...] += jnp.dot(p_ref[...], h_ref[...], preferred_element_type=jnp.float32)

    @pl.when(k == pl.num_programs(0) - 1)
    def _():
        out_ref[...] = (
            jnp.dot(acc_ref[...], w_head_ref[...], preferred_element_type=jnp.float32)
            + b_head_ref[...]).astype(out_ref.dtype)


# ----------------------------------------------------------------------------------------------
# Host-side glue
# ----------------------------------------------------------------------------------------------
def _build_adjacency(edge_index, n, normalize_adj):
    f32 = jnp.float32
    src, dst = edge_index[0], edge_index[1]
    adj = jnp.zeros((n, n), f32).at[dst, src].set(1.0)        # message flows src -> dst
    if normalize_adj:
        diag = jnp.arange(n)
        adj = adj.at[diag, diag].set(1.0)                     # self loops
        deg = jnp.sum(adj, axis=1)
        d_inv_sqrt = jax.lax.rsqrt(jnp.maximum(deg, 1e-12))
        adj = d_inv_sqrt[:, None] * adj * d_inv_sqrt[None, :]
    return adj


def _build_pooling(node_graph_idx, n_pad, g_pad, graph_pooling):
    f32 = jnp.float32
    n = node_graph_idx.shape[0]
    idx_pad = jnp.full((n_pad,), -1, jnp.int32).at[:n].set(node_graph_idx.astype(jnp.int32))
    p = (idx_pad[None, :] == jnp.arange(g_pad, dtype=jnp.int32)[:, None]).astype(f32)
    if graph_pooling == "mean":
        p = p / jnp.maximum(jnp.sum(p, axis=1, keepdims=True), 1.0)
    elif graph_pooling != "add":
        # TODO(synk): 'max' graph pooling has no pooling-matmul equivalent; only add/mean here.
        raise NotImplementedError(f"graph_pooling={graph_pooling!r}")
    return p


def gan_discriminator_forward(x, edge_index, node_graph_idx, predicate_states, params,
                              *, normalize_adj=True, graph_pooling="add"):
    """x: [N, F] node features; edge_index: [2, E]; node_graph_idx: [N];
    predicate_states: [num_graphs, P] (or [num_graphs]); params: dict of weights."""
    f32, bf16 = jnp.float32, jnp.bfloat16
    n = x.shape[0]

    if predicate_states.ndim == 1:
        predicate_states = predicate_states[:, None]
    num_graphs = predicate_states.shape[0]

    # glue: propagate_over_batches equivalent (per-graph predicate state broadcast onto nodes)
    h0 = jnp.concatenate(
        [x.astype(f32), predicate_states.astype(f32)[node_graph_idx]], axis=1)
    d0 = h0.shape[1]
    h_hid = params["w_pre"].shape[1]
    d_out = params["w_head"].shape[1]

    # padding / tiling plan: node axis to a tight multiple of 128 (tiles divide n_pad),
    # graph axis to sublane (8), head output lane-dense (128)
    n_pad, tm, tk = _plan_node_tiling(n)
    tm1 = _divisor_tile(n_pad, TM1_CAP)
    g_pad = _round_up(max(num_graphs, 8), 8)
    d_out_pad = _round_up(max(d_out, 128), 128)

    h0_pad = jnp.zeros((n_pad, d0), bf16).at[:n].set(h0.astype(bf16))
    a_pad = jnp.zeros((n_pad, n_pad), bf16).at[:n, :n].set(
        _build_adjacency(edge_index, n, normalize_adj).astype(bf16))
    p_pad = _build_pooling(node_graph_idx, n_pad, g_pad, graph_pooling).astype(bf16)
    w_head_pad = jnp.zeros((h_hid, d_out_pad), f32).at[:, :d_out].set(
        params["w_head"].astype(f32))
    b_head_pad = jnp.zeros((1, d_out_pad), f32).at[0, :d_out].set(
        params["b_head"].astype(f32).reshape(-1))
    alphas = params["alphas"].astype(f32)

    smem_spec = pl.BlockSpec(memory_space=pltpu.MemorySpace.SMEM)

    # --- K1: pre_mp (Linear + bias + PReLU) fused with mp_layer0 node transform (@ W_mp0) ------
    # Overhead-bound: big row tile, all matmul operands bf16, f32 accumulation.
    z0 = pl.pallas_call(
        premp_kernel,
        out_shape=jax.ShapeDtypeStruct((n_pad, h_hid), bf16),
        grid=(n_pad // tm1,),
        in_specs=[
            pl.BlockSpec((tm1, d0), lambda i: (i, 0)),
            pl.BlockSpec((d0, h_hid), lambda i: (0, 0)),
            pl.BlockSpec((1, h_hid), lambda i: (0, 0)),
            pl.BlockSpec((h_hid, h_hid), lambda i: (0, 0)),
            smem_spec,
        ],
        out_specs=pl.BlockSpec((tm1, h_hid), lambda i: (i, 0)),
        compiler_params=pltpu.CompilerParams(dimension_semantics=("parallel",)),
    )(h0_pad, params["w_pre"].astype(bf16),
      params["b_pre"].astype(f32).reshape(1, h_hid),
      params["w_mp0"].astype(bf16), alphas)

    # explicit scoped-VMEM budget for the aggregation kernels (safe on v5e/v6e/v7x)
    agg_vmem_bytes = (2 * tm * tk * 2          # double-buffered bf16 A tile
                      + 2 * n_pad * h_hid * 2  # resident xw (budget 2 buffers)
                      + tm * h_hid * 4         # f32 accumulator
                      + 2 * tm * h_hid * 2     # double-buffered bf16 output tile
                      + 8 * h_hid * h_hid)     # weights / bias slack
    vmem_limit = int(min(40 << 20, max(2 * agg_vmem_bytes, 16 << 20)))
    agg_params = pltpu.CompilerParams(
        dimension_semantics=("parallel", "arbitrary"),
        vmem_limit_bytes=vmem_limit)

    # --- K2 / K3: tiled GCN aggregation  PReLU(A @ Xw + b) [@ W_next], reduction axis last -----
    # A is streamed in (tm, tk) bf16 tiles; Xw stays VMEM-resident across the whole grid.
    def mp_aggregate(xw, b_conv, alpha_idx, w_next):
        apply_w_next = w_next is not None
        kernel = functools.partial(mp_agg_kernel, alpha_idx=alpha_idx,
                                   apply_w_next=apply_w_next, tk=tk)
        operands = [a_pad, xw, b_conv.astype(f32).reshape(1, h_hid)]
        in_specs = [
            pl.BlockSpec((tm, tk), lambda i, k: (i, k)),
            pl.BlockSpec((n_pad, h_hid), lambda i, k: (0, 0)),   # resident, DMA'd once
            pl.BlockSpec((1, h_hid), lambda i, k: (0, 0)),
        ]
        if apply_w_next:
            operands.append(w_next.astype(bf16))
            in_specs.append(pl.BlockSpec((h_hid, h_hid), lambda i, k: (0, 0)))
        operands.append(alphas)
        in_specs.append(smem_spec)
        return pl.pallas_call(
            kernel,
            out_shape=jax.ShapeDtypeStruct((n_pad, h_hid), bf16),
            grid=(n_pad // tm, n_pad // tk),
            in_specs=in_specs,
            out_specs=pl.BlockSpec((tm, h_hid), lambda i, k: (i, 0)),
            scratch_shapes=[pltpu.VMEM((tm, h_hid), f32)],
            compiler_params=agg_params,
        )(*operands)

    z1 = mp_aggregate(z0, params["b_mp0"], alpha_idx=1, w_next=params["w_mp1"])  # = h2 @ W_mp1
    h3 = mp_aggregate(z1, params["b_mp1"], alpha_idx=2, w_next=None)             # = h3

    # --- K4: GraphHead — add/mean pooling (P @ h3) + 1-layer MLP with bias, lane-dense out -----
    out_pad = pl.pallas_call(
        pool_head_kernel,
        out_shape=jax.ShapeDtypeStruct((g_pad, d_out_pad), f32),
        grid=(n_pad // tk,),
        in_specs=[
            pl.BlockSpec((g_pad, tk), lambda k: (0, k)),
            pl.BlockSpec((tk, h_hid), lambda k: (k, 0)),
            pl.BlockSpec((h_hid, d_out_pad), lambda k: (0, 0)),
            pl.BlockSpec((1, d_out_pad), lambda k: (0, 0)),
        ],
        out_specs=pl.BlockSpec((g_pad, d_out_pad), lambda k: (0, 0)),
        scratch_shapes=[pltpu.VMEM((g_pad, h_hid), f32)],
        compiler_params=pltpu.CompilerParams(dimension_semantics=("arbitrary",)),
    )(p_pad, h3, w_head_pad, b_head_pad)

    return out_pad[:num_graphs, :d_out]


# ----------------------------------------------------------------------------------------------
# Pure-JAX reference (f32, dense) for correctness checking
# ----------------------------------------------------------------------------------------------
def reference_forward(x, edge_index, node_graph_idx, predicate_states, params,
                      *, normalize_adj=True, graph_pooling="add"):
    f32 = jnp.float32
    if predicate_states.ndim == 1:
        predicate_states = predicate_states[:, None]
    num_graphs = predicate_states.shape[0]
    h0 = jnp.concatenate(
        [x.astype(f32), predicate_states.astype(f32)[node_graph_idx]], axis=1)
    a = _build_adjacency(edge_index, x.shape[0], normalize_adj)
    al = params["alphas"].astype(f32)
    h1 = _prelu(h0 @ params["w_pre"] + params["b_pre"].reshape(1, -1), al[0])
    h2 = _prelu(a @ (h1 @ params["w_mp0"]) + params["b_mp0"].reshape(1, -1), al[1])
    h3 = _prelu(a @ (h2 @ params["w_mp1"]) + params["b_mp1"].reshape(1, -1), al[2])
    pooled = jax.ops.segment_sum(h3, node_graph_idx, num_segments=num_graphs)
    if graph_pooling == "mean":
        counts = jax.ops.segment_sum(jnp.ones((x.shape[0], 1), f32), node_graph_idx,
                                     num_segments=num_graphs)
        pooled = pooled / jnp.maximum(counts, 1.0)
    return pooled @ params["w_head"] + params["b_head"].reshape(1, -1)


def _xavier_uniform(key, shape):
    fan_in, fan_out = shape
    limit = (6.0 / (fan_in + fan_out)) ** 0.5
    return jax.random.uniform(key, shape, jnp.float32, -limit, limit)


if __name__ == "__main__":
    key = jax.random.PRNGKey(0)
    k_x, k_pred, k_pre, k_mp0, k_mp1, k_head = jax.random.split(key, 6)

    # small synthetic batch: 2 graphs with 5 + 3 nodes
    nodes_per_graph = [5, 3]
    N = sum(nodes_per_graph)
    G = len(nodes_per_graph)
    D_NODE, D_PRED, HIDDEN, D_OUT = 19, 1, 32, 1

    x = jax.random.normal(k_x, (N, D_NODE), jnp.float32)
    predicate_states = jax.random.bernoulli(k_pred, 0.5, (G, D_PRED)).astype(jnp.float32)

    # chain edges inside each graph, both directions
    e0 = [(0, 1), (1, 2), (2, 3), (3, 4)]
    e1 = [(5, 6), (6, 7)]
    edges = e0 + [(b, a) for a, b in e0] + e1 + [(b, a) for a, b in e1]
    edge_index = jnp.array(edges, jnp.int32).T                 # [2, 12]
    node_graph_idx = jnp.array([0] * 5 + [1] * 3, jnp.int32)

    # deterministic parameter init (xavier weights, zero biases — matches pyg init_weights)
    D_IN = D_NODE + D_PRED
    params = {
        "w_pre": _xavier_uniform(k_pre, (D_IN, HIDDEN)),
        "b_pre": jnp.zeros((1, HIDDEN), jnp.float32),
        "w_mp0": _xavier_uniform(k_mp0, (HIDDEN, HIDDEN)),
        "b_mp0": jnp.zeros((1, HIDDEN), jnp.float32),
        "w_mp1": _xavier_uniform(k_mp1, (HIDDEN, HIDDEN)),
        "b_mp1": jnp.zeros((1, HIDDEN), jnp.float32),
        "w_head": _xavier_uniform(k_head, (HIDDEN, D_OUT)),
        "b_head": jnp.zeros((D_OUT,), jnp.float32),
        "alphas": jnp.array([0.25, 0.25, 0.25], jnp.float32),   # PReLU slopes
    }

    out = gan_discriminator_forward(x, edge_index, node_graph_idx, predicate_states, params,
                                    normalize_adj=True, graph_pooling="add")
    out = jax.block_until_ready(out)
    assert out.shape == (G, D_OUT)
    assert bool(jnp.all(jnp.isfinite(out)))

    ref = reference_forward(x, edge_index, node_graph_idx, predicate_states, params,
                            normalize_adj=True, graph_pooling="add")
    ref = jax.block_until_ready(ref)
    max_err = float(jnp.max(jnp.abs(out - ref)))
    tol = 5e-2 * (1.0 + float(jnp.max(jnp.abs(ref))))           # bf16 aggregation tolerance
    assert max_err <= tol, f"mismatch vs f32 reference: max_err={max_err} tol={tol}"

    print("KERNEL_OK")
</pallas_src>

<mosaic_0001>
module attributes {stable_mosaic.version = 11 : i64} {
  func.func @premp_kernel(%arg0: i32, %arg1: memref<128x20xbf16, #tpu.memory_space<vmem>>, %arg2: memref<20x32xbf16, #tpu.memory_space<vmem>>, %arg3: memref<1x32xf32, #tpu.memory_space<vmem>>, %arg4: memref<32x32xbf16, #tpu.memory_space<vmem>>, %arg5: memref<3xf32, #tpu.memory_space<smem>>, %arg6: memref<128x32xbf16, #tpu.memory_space<vmem>>) attributes {dimension_semantics = [#tpu.dimension_semantics<parallel>], iteration_bounds = array<i64: 1>, scalar_prefetch = 0 : i64, scratch_operands = 0 : i64, tpu.core_type = #tpu.core_type<tc>, window_params = [{transform_indices = @transform_0, window_bounds = array<i64: 128, 20>}, {pipeline_mode = #tpu.pipeline_mode<synchronous>, transform_indices = @transform_1, window_bounds = array<i64: 20, 32>}, {pipeline_mode = #tpu.pipeline_mode<synchronous>, transform_indices = @transform_2, window_bounds = array<i64: 1, 32>}, {pipeline_mode = #tpu.pipeline_mode<synchronous>, transform_indices = @transform_3, window_bounds = array<i64: 32, 32>}, {transform_indices = @transform_4, window_bounds = array<i64: 3>}, {transform_indices = @transform_5, window_bounds = array<i64: 128, 32>}]} {
    %c0 = arith.constant 0 : index
    %c0_0 = arith.constant 0 : index
    %0 = vector.load %arg1[%c0, %c0_0] : memref<128x20xbf16, #tpu.memory_space<vmem>>, vector<128x20xbf16>
    %c0_1 = arith.constant 0 : index
    %c0_2 = arith.constant 0 : index
    %1 = vector.load %arg2[%c0_1, %c0_2] : memref<20x32xbf16, #tpu.memory_space<vmem>>, vector<20x32xbf16>
    %cst = arith.constant dense<0.000000e+00> : vector<128x32xf32>
    %2 = tpu.matmul %0, %1, %cst {dimension_numbers = #tpu.dot_dimension_numbers<[1], [0], [0], [1], [0, 0, 1, 1], [], []>} : vector<128x20xbf16>, vector<20x32xbf16>, vector<128x32xf32> -> vector<128x32xf32>
    %c0_3 = arith.constant 0 : index
    %c0_4 = arith.constant 0 : index
    %3 = vector.load %arg3[%c0_3, %c0_4] : memref<1x32xf32, #tpu.memory_space<vmem>>, vector<1x32xf32>
    %4 = vector.broadcast %3 : vector<1x32xf32> to vector<128x32xf32>
    %5 = arith.addf %2, %4 : vector<128x32xf32>
    %c0_5 = arith.constant 0 : index
    %6 = memref.load %arg5[%c0_5] : memref<3xf32, #tpu.memory_space<smem>>
    %cst_6 = arith.constant 0.000000e+00 : f32
    %7 = vector.broadcast %cst_6 : f32 to vector<128x32xf32>
    %8 = arith.cmpf oge, %5, %7 : vector<128x32xf32>
    %9 = vector.broadcast %6 : f32 to vector<128x32xf32>
    %10 = arith.mulf %9, %5 : vector<128x32xf32>
    %11 = arith.select %8, %5, %10 : vector<128x32xi1>, vector<128x32xf32>
    %12 = arith.truncf %11 : vector<128x32xf32> to vector<128x32xbf16>
    %c0_7 = arith.constant 0 : index
    %c0_8 = arith.constant 0 : index
    %13 = vector.load %arg4[%c0_7, %c0_8] : memref<32x32xbf16, #tpu.memory_space<vmem>>, vector<32x32xbf16>
    %cst_9 = arith.constant dense<0.000000e+00> : vector<128x32xf32>
    %14 = tpu.matmul %12, %13, %cst_9 {dimension_numbers = #tpu.dot_dimension_numbers<[1], [0], [0], [1], [0, 0, 1, 1], [], []>} : vector<128x32xbf16>, vector<32x32xbf16>, vector<128x32xf32> -> vector<128x32xf32>
    %15 = arith.truncf %14 : vector<128x32xf32> to vector<128x32xbf16>
    %c0_10 = arith.constant 0 : index
    %c0_11 = arith.constant 0 : index
    %16 = vector.load %arg6[%c0_10, %c0_11] : memref<128x32xbf16, #tpu.memory_space<vmem>>, vector<128x32xbf16>
    tpu.vector_store %arg6[%c0_10, %c0_11], %15 {strides = array<i32>} : memref<128x32xbf16, #tpu.memory_space<vmem>>, vector<128x32xbf16>,
    return
  }
  func.func @transform_0(%arg0: i32) -> (i32, i32) {
    %c0_i32 = arith.constant 0 : i32
    %c0_i32_0 = arith.constant 0 : i32
    return %arg0, %c0_i32 : i32, i32
  }
  func.func @transform_1(%arg0: i32) -> (i32, i32) {
    %c0_i32 = arith.constant 0 : i32
    %c0_i32_0 = arith.constant 0 : i32
    %c0_i32_1 = arith.constant 0 : i32
    return %c0_i32, %c0_i32_0 : i32, i32
  }
  func.func @transform_2(%arg0: i32) -> (i32, i32) {
    %c0_i32 = arith.constant 0 : i32
    %c0_i32_0 = arith.constant 0 : i32
    %c0_i32_1 = arith.constant 0 : i32
    return %c0_i32, %c0_i32_0 : i32, i32
  }
  func.func @transform_3(%arg0: i32) -> (i32, i32) {
    %c0_i32 = arith.constant 0 : i32
    %c0_i32_0 = arith.constant 0 : i32
    %c0_i32_1 = arith.constant 0 : i32
    return %c0_i32, %c0_i32_0 : i32, i32
  }
  func.func @transform_4(%arg0: i32) -> i32 {
    %c0_i32 = arith.constant 0 : i32
    %c0_i32_0 = arith.constant 0 : i32
    return %c0_i32 : i32
  }
  func.func @transform_5(%arg0: i32) -> (i32, i32) {
    %c0_i32 = arith.constant 0 : i32
    %c0_i32_0 = arith.constant 0 : i32
    return %arg0, %c0_i32 : i32, i32
  }
}

</mosaic_0001>

<bundles_post_ra>
// kernel: tpu_custom_call.1
= control target key start
LH: loop header
LB: loop body
LE: loop exit
PB: predicated region body
PF: predicated region fallthrough
CT: control target
= control target key end

     0   :  { %10 = vsyncpa [#allocation3], 0  ;;  %s855_s0 = inlined_call_operand.vmem [shape: bf16[128,20], index: 0, kind: input, shape index: {}]   ;;  %s856_s1 = inlined_call_operand.vmem [shape: bf16[20,32], index: 1, kind: input, shape index: {}]   ;;  %s857_s2 = inlined_call_operand.vmem [shape: f32[1,32], index: 2, kind: input, shape index: {}]   ;;  %s858_s3 = inlined_call_operand.vmem [shape: bf16[32,32], index: 3, kind: input, shape index: {}]   ;;  %s859_s4 = inlined_call_operand.vmem [shape: f32[3], index: 4, kind: input, shape index: {}]   ;;  %s860_s5 = inlined_call_operand.vmem [shape: bf16[128,32], index: 5, kind: output, shape index: {}]  }
   0x1   :  { %s25_s20 = sshll.u32 %s859_s4, 4  ;;  %s26_s20 = int_to_ptr.vmem [resolvable:$true] %s25_s20 }
   0x2   :  { %s652_s21 = scalar_lea.vmem %s26_s20, 16  ;;  %p657_p1 = scmp.lt.s32.totalorder %s26_s20, %s26_s20 }
   0x3   :  { %p653_p0 = scmp.ne.s32.totalorder %s26_s20, %s652_s21  ;;  %p658_p2 = scmp.lt.s32.totalorder %s652_s21, %s652_s21 }
   0x5   :  { %p659_p3 = por %p658_p2, %p657_p1 }
   0x7   :  { %p660_p4 = pnand %p659_p3, %p653_p0 }
   0x9   :  { %663 = shalt.err (!%p660_p4)
}
   0xa   :  { %s666_s22 = smov [#allocation2]  }
   0xb   :  { %28 = dma.vmem_to_smem %s26_s20, 16, %s666_s22, [#allocation3]  }
   0xc   :  { %664 = dma.done.wait [#allocation3], 16  }
   0xd   :  { %665 = vsyncadd [#allocation3], 4294967280 }
   0xe   :  { %32 = sfence }
   0xf   :  { %v640_v0 = vld [vmem:[%s856_s1] sm:$0xff]   ;;  %vm134_vm0 = vcmask 1041408   ;;  %v641_v1 = vld [vmem:[%s856_s1 + $0x8] ss:$0 sps:$4 sm:$0x33]   ;;  %vm109_vm1 = vcmask 162816  }
  0x10   :  { %v642_v2 = vld [vmem:[%s855_s0] sm:$0xff]   ;;  %598 = vmatprep.subr.bf16.mxu0 %v640_v0  ;;  %v136_v3 = vsel %vm134_vm0, %v641_v1, 0  ;;  %v643_v4 = vld [vmem:[%s855_s0 + $0x8] sm:$0xff]   ;;  %v644_v5 = vld [vmem:[%s855_s0 + $0x10] sm:$0xff]   ;;  %s235_s20 = sld [smem:[#allocation2]]  ;;  %vm309_vm6 = vcmask 261120  }
  0x11   :  { %599 = vmatpush3.bf16.msra.mxu0 %v640_v0  ;;  %602 = vmatprep.mubr.msk.bf16.mxu0 %vm109_vm1, %v642_v2  ;;  %v645_v6 = vld [vmem:[%s855_s0 + $0x18] sm:$0xff]   ;;  %v646_v7 = vld [vmem:[%s855_s0 + $0x20] sm:$0xff]   ;;  %v647_v8 = vld [vmem:[%s855_s0 + $0x28] sm:$0xff]  }
  0x12   :  { %638 = vmatprep.subr.msk.bf16.mxu0 %vm134_vm0, %v641_v1  ;;  %v648_v9 = vld [vmem:[%s855_s0 + $0x30] sm:$0xff]   ;;  %v649_v10 = vld [vmem:[%s855_s0 + $0x38] sm:$0xff]   ;;  %v650_v11 = vld [vmem:[%s858_s3] sm:$0xff]  }
  0x13   :  { %618 = vmatprep.subr.bf16.mxu1 %v650_v11  ;;  %v651_v12 = vld [vmem:[%s858_s3 + $0x8] sm:$0xff]   ;;  %v747_v13 = vld [vmem:[%s857_s2] ss:$0 sm:$0xff] }
  0x14   :  { %619 = vmatpush3.bf16.msra.mxu1 %v650_v11 }
  0x15   :  { %601 = vmatpush3.bf16.msra.mxu0 %v136_v3  ;;  %620 = vmatprep.subr.bf16.mxu1 %v651_v12 }
  0x16   :  { %v749_v15 = vstv %s235_s20 }
  0x18   :  { %603 = vmatmul.mubr.msk.bf16.vlgmr.msra.gmra.mrb[0].mxu0 %vm109_vm1, %v643_v4  ;;  %621 = vmatpush3.bf16.msra.mxu1 %v651_v12 }
  0x19   :  { %606 = vmatprep.mubr.msk.bf16.mxu0 %vm109_vm1, %v644_v5 }
  0x20   :  { %607 = vmatmul.mubr.msk.bf16.gmra.mrb[4].mxu0 %vm109_vm1, %v645_v6 }
  0x21   :  { %610 = vmatprep.mubr.msk.bf16.mxu0 %vm109_vm1, %v646_v7 }
  0x28   :  { %611 = vmatmul.mubr.msk.bf16.gmra.mrb[8].mxu0 %vm109_vm1, %v647_v8 }
  0x29   :  { %614 = vmatprep.mubr.msk.bf16.mxu0 %vm109_vm1, %v648_v9 }
  0x30   :  { %615 = vmatmul.mubr.msk.bf16.gmra.mrb[12].mxu0 %vm109_vm1, %v649_v10 }
  0xeb   :  { %v604_v14 = vpop.f32.mrb[0].mxu0 }
  0xec   :  { %v181_v16 = vadd.f32 %v604_v14, %v747_v13  ;;  %v172_v17 = vpop.f32.mrb[1].mxu0 }
  0xed   :  { %v173_v18 = vadd.f32 %v747_v13, %v172_v17  ;;  %v605_v19 = vpop.f32.mrb[2].mxu0 }
  0xee   :  { %v255_v20 = vmul.f32 %v749_v15, %v181_v16  ;;  %v184_v21 = vadd.f32 %v605_v19, %v747_v13  ;;  %v175_v22 = vpop.f32.mrb[3].mxu0  ;;  %vm238_vm2 = vcmp.ge.f32.partialorder %v181_v16, 0.0 }
  0xef   :  { %v253_v23 = vmul.f32 %v749_v15, %v173_v18  ;;  %v176_v24 = vadd.f32 %v747_v13, %v175_v22  ;;  %vm236_vm4 = vcmp.ge.f32.partialorder %v173_v18, 0.0 }
  0xf0   :  { %vm239_vm3 = vcmp.ge.f32.partialorder %v184_v21, 0.0  ;;  %v256_v25 = vmul.f32 %v749_v15, %v184_v21  ;;  %v271_v27 = vsel %vm238_vm2, %v181_v16, %v255_v20 }
  0xf1   :  { %v254_v26 = vmul.f32 %v749_v15, %v176_v24  ;;  %vm237_vm5 = vcmp.ge.f32.partialorder %v176_v24, 0.0  ;;  %v269_v31 = vsel %vm236_vm4, %v173_v18, %v253_v23 }
  0xf2   :  { %v272_v28 = vsel %vm239_vm3, %v184_v21, %v256_v25  ;;  %vm495_vm3 = vcmask 257024  }
  0xf3   :  { %v286_v29 = vpack.c.bf16 %v272_v28, %v271_v27  ;;  %v608_v30 = vpop.f32.mrb[4].mxu0  ;;  %v270_v32 = vsel %vm237_vm5, %v176_v24, %v254_v26 }
  0xf4   :  { %v197_v33 = vadd.f32 %v608_v30, %v747_v13  ;;  %v188_v34 = vpop.f32.mrb[5].mxu0  ;;  %v285_v35 = vpack.c.bf16 %v270_v32, %v269_v31 }
  0xf5   :  { %v189_v36 = vadd.f32 %v747_v13, %v188_v34  ;;  %v609_v37 = vpop.f32.mrb[6].mxu0 }
  0xf6   :  { %v259_v38 = vmul.f32 %v749_v15, %v197_v33  ;;  %v200_v39 = vadd.f32 %v609_v37, %v747_v13  ;;  %v191_v40 = vpop.f32.mrb[7].mxu0  ;;  %622 = vmatprep.mubr.msk.bf16.mxu1 %vm309_vm6, %v285_v35  ;;  %vm242_vm7 = vcmp.ge.f32.partialorder %v197_v33, 0.0 }
  0xf7   :  { %v257_v41 = vmul.f32 %v749_v15, %v189_v36  ;;  %v192_v42 = vadd.f32 %v747_v13, %v191_v40  ;;  %623 = vmatmul.mubr.msk.bf16.vlgmr.msra.gmra.mrb[0].mxu1 %vm309_vm6, %v286_v29  ;;  %vm240_vm8 = vcmp.ge.f32.partialorder %v189_v36, 0.0 }
  0xf8   :  { %vm243_vm9 = vcmp.ge.f32.partialorder %v200_v39, 0.0  ;;  %v260_v43 = vmul.f32 %v749_v15, %v200_v39  ;;  %v275_v45 = vsel %vm242_vm7, %v197_v33, %v259_v38 }
  0xf9   :  { %vm241_vm10 = vcmp.ge.f32.partialorder %v192_v42, 0.0  ;;  %v258_v44 = vmul.f32 %v749_v15, %v192_v42  ;;  %v273_v47 = vsel %vm240_vm8, %v189_v36, %v257_v41 }
  0xfa   :  { %v276_v46 = vsel %vm243_vm9, %v200_v39, %v260_v43 }
  0xfb   :  { %v288_v48 = vpack.c.bf16 %v276_v46, %v275_v45  ;;  %v274_v49 = vsel %vm241_vm10, %v192_v42, %v258_v44  ;;  %v612_v50 = vpop.f32.mrb[8].mxu0 }
  0xfc   :  { %v287_v51 = vpack.c.bf16 %v274_v49, %v273_v47  ;;  %v213_v52 = vadd.f32 %v612_v50, %v747_v13  ;;  %v204_v53 = vpop.f32.mrb[9].mxu0 }
  0xfd   :  { %v205_v54 = vadd.f32 %v747_v13, %v204_v53  ;;  %v613_v55 = vpop.f32.mrb[10].mxu0 }
  0xfe   :  { %v263_v56 = vmul.f32 %v749_v15, %v213_v52  ;;  %v216_v57 = vadd.f32 %v613_v55, %v747_v13  ;;  %v207_v58 = vpop.f32.mrb[11].mxu0  ;;  %626 = vmatprep.mubr.msk.bf16.mxu1 %vm309_vm6, %v287_v51  ;;  %vm246_vm11 = vcmp.ge.f32.partialorder %v213_v52, 0.0 }
  0xff   :  { %v261_v59 = vmul.f32 %v749_v15, %v205_v54  ;;  %v208_v60 = vadd.f32 %v747_v13, %v207_v58  ;;  %627 = vmatmul.mubr.msk.bf16.gmra.mrb[4].mxu1 %vm309_vm6, %v288_v48  ;;  %vm244_vm12 = vcmp.ge.f32.partialorder %v205_v54, 0.0 }
 0x100   :  { %vm247_vm13 = vcmp.ge.f32.partialorder %v216_v57, 0.0  ;;  %v264_v61 = vmul.f32 %v749_v15, %v216_v57  ;;  %v279_v63 = vsel %vm246_vm11, %v213_v52, %v263_v56 }
 0x101   :  { %vm245_vm14 = vcmp.ge.f32.partialorder %v208_v60, 0.0  ;;  %v262_v62 = vmul.f32 %v749_v15, %v208_v60  ;;  %v277_v1 = vsel %vm244_vm12, %v205_v54, %v261_v59 }
 0x102   :  { %v280_v0 = vsel %vm247_vm13, %v216_v57, %v264_v61 }
 0x103   :  { %v290_v2 = vpack.c.bf16 %v280_v0, %v279_v63  ;;  %v278_v3 = vsel %vm245_vm14, %v208_v60, %v262_v62  ;;  %v616_v4 = vpop.f32.mrb[12].mxu0 }
 0x104   :  { %v289_v5 = vpack.c.bf16 %v278_v3, %v277_v1  ;;  %v229_v6 = vadd.f32 %v616_v4, %v747_v13  ;;  %v220_v7 = vpop.f32.mrb[13].mxu0 }
 0x105   :  { %v221_v8 = vadd.f32 %v747_v13, %v220_v7  ;;  %v617_v9 = vpop.f32.mrb[14].mxu0 }
 0x106   :  { %v267_v10 = vmul.f32 %v749_v15, %v229_v6  ;;  %v232_v11 = vadd.f32 %v617_v9, %v747_v13  ;;  %v223_v12 = vpop.f32.mrb[15].mxu0  ;;  %630 = vmatprep.mubr.msk.bf16.mxu1 %vm309_vm6, %v289_v5  ;;  %vm250_vm15 = vcmp.ge.f32.partialorder %v229_v6, 0.0 }
 0x107   :  { %v265_v14 = vmul.f32 %v749_v15, %v221_v8  ;;  %v224_v16 = vadd.f32 %v747_v13, %v223_v12  ;;  %631 = vmatmul.mubr.msk.bf16.gmra.mrb[8].mxu1 %vm309_vm6, %v290_v2  ;;  %vm248_vm0 = vcmp.ge.f32.partialorder %v221_v8, 0.0 }
 0x108   :  { %vm251_vm1 = vcmp.ge.f32.partialorder %v232_v11, 0.0  ;;  %v268_v17 = vmul.f32 %v749_v15, %v232_v11  ;;  %v283_v19 = vsel %vm250_vm15, %v229_v6, %v267_v10 }
 0x109   :  { %vm249_vm2 = vcmp.ge.f32.partialorder %v224_v16, 0.0  ;;  %v266_v18 = vmul.f32 %v749_v15, %v224_v16  ;;  %v281_v21 = vsel %vm248_vm0, %v221_v8, %v265_v14 }
 0x10a   :  { %v284_v20 = vsel %vm251_vm1, %v232_v11, %v268_v17 }
 0x10b   :  { %v292_v22 = vpack.c.bf16 %v284_v20, %v283_v19  ;;  %v282_v23 = vsel %vm249_vm2, %v224_v16, %v266_v18 }
 0x10c   :  { %v291_v24 = vpack.c.bf16 %v282_v23, %v281_v21 }
 0x10e   :  { %634 = vmatprep.mubr.msk.bf16.mxu1 %vm309_vm6, %v291_v24 }
 0x10f   :  { %635 = vmatmul.mubr.msk.bf16.gmra.mrb[12].mxu1 %vm309_vm6, %v292_v22 }
 0x1ca   :  { %v624_v13 = vpop.f32.mrb[0].mxu1 }
 0x1cb   :  { %v564_v25 = vpack.c.bf16 %v624_v13, %v624_v13  ;;  %v368_v26 = vpop.f32.mrb[1].mxu1 }
 0x1cc   :  { %v562_v27 = vpack.c.bf16 %v368_v26, %v368_v26  ;;  %v625_v28 = vpop.f32.mrb[2].mxu1 }
 0x1cd   :  { %498 = vst.msk [vmem:[%s860_s5 + $0x8] sm:$0xf] %vm495_vm3, %v564_v25  ;;  %v565_v15 = vpack.c.bf16 %v625_v28, %v625_v28  ;;  %v371_v29 = vpop.f32.mrb[3].mxu1 }
 0x1ce   :  { %496 = vst.msk [vmem:[%s860_s5] sm:$0xf] %vm495_vm3, %v562_v27  ;;  %v563_v30 = vpack.c.bf16 %v371_v29, %v371_v29 }
 0x1cf   :  { %499 = vst.msk [vmem:[%s860_s5 + $0xc] sm:$0xf] %vm495_vm3, %v565_v15 }
 0x1d0   :  { %497 = vst.msk [vmem:[%s860_s5 + $0x4] sm:$0xf] %vm495_vm3, %v563_v30 }
 0x1d2   :  { %v628_v31 = vpop.f32.mrb[4].mxu1 }
 0x1d3   :  { %v568_v32 = vpack.c.bf16 %v628_v31, %v628_v31  ;;  %v384_v33 = vpop.f32.mrb[5].mxu1 }
 0x1d4   :  { %v566_v34 = vpack.c.bf16 %v384_v33, %v384_v33  ;;  %v629_v35 = vpop.f32.mrb[6].mxu1 }
 0x1d5   :  { %502 = vst.msk [vmem:[%s860_s5 + $0x18] sm:$0xf] %vm495_vm3, %v568_v32  ;;  %v569_v36 = vpack.c.bf16 %v629_v35, %v629_v35  ;;  %v387_v37 = vpop.f32.mrb[7].mxu1 }
 0x1d6   :  { %500 = vst.msk [vmem:[%s860_s5 + $0x10] sm:$0xf] %vm495_vm3, %v566_v34  ;;  %v567_v38 = vpack.c.bf16 %v387_v37, %v387_v37 }
 0x1d7   :  { %503 = vst.msk [vmem:[%s860_s5 + $0x1c] sm:$0xf] %vm495_vm3, %v569_v36 }
 0x1d8   :  { %501 = vst.msk [vmem:[%s860_s5 + $0x14] sm:$0xf] %vm495_vm3, %v567_v38 }
 0x1da   :  { %v632_v39 = vpop.f32.mrb[8].mxu1 }
 0x1db   :  { %v572_v40 = vpack.c.bf16 %v632_v39, %v632_v39  ;;  %v400_v41 = vpop.f32.mrb[9].mxu1 }
 0x1dc   :  { %v570_v42 = vpack.c.bf16 %v400_v41, %v400_v41  ;;  %v633_v43 = vpop.f32.mrb[10].mxu1 }
 0x1dd   :  { %506 = vst.msk [vmem:[%s860_s5 + $0x28] sm:$0xf] %vm495_vm3, %v572_v40  ;;  %v573_v44 = vpack.c.bf16 %v633_v43, %v633_v43  ;;  %v403_v45 = vpop.f32.mrb[11].mxu1 }
 0x1de   :  { %504 = vst.msk [vmem:[%s860_s5 + $0x20] sm:$0xf] %vm495_vm3, %v570_v42  ;;  %v571_v46 = vpack.c.bf16 %v403_v45, %v403_v45 }
 0x1df   :  { %507 = vst.msk [vmem:[%s860_s5 + $0x2c] sm:$0xf] %vm495_vm3, %v573_v44 }
 0x1e0   :  { %505 = vst.msk [vmem:[%s860_s5 + $0x24] sm:$0xf] %vm495_vm3, %v571_v46 }
 0x1e2   :  { %v636_v47 = vpop.f32.mrb[12].mxu1 }
 0x1e3   :  { %v576_v48 = vpack.c.bf16 %v636_v47, %v636_v47  ;;  %v416_v49 = vpop.f32.mrb[13].mxu1 }
 0x1e4   :  { %v574_v50 = vpack.c.bf16 %v416_v49, %v416_v49  ;;  %v637_v51 = vpop.f32.mrb[14].mxu1 }
 0x1e5   :  { %510 = vst.msk [vmem:[%s860_s5 + $0x38] sm:$0xf] %vm495_vm3, %v576_v48  ;;  %v577_v52 = vpack.c.bf16 %v637_v51, %v637_v51  ;;  %v419_v53 = vpop.f32.mrb[15].mxu1 }
 0x1e6   :  { %508 = vst.msk [vmem:[%s860_s5 + $0x30] sm:$0xf] %vm495_vm3, %v574_v50  ;;  %v575_v54 = vpack.c.bf16 %v419_v53, %v419_v53 }
 0x1e7   :  { %511 = vst.msk [vmem:[%s860_s5 + $0x3c] sm:$0xf] %vm495_vm3, %v577_v52 }
 0x1e8   :  { %509 = vst.msk [vmem:[%s860_s5 + $0x34] sm:$0xf] %vm495_vm3, %v575_v54 }
 0x1e9   :  { %516 = vsyncpa [#allocation3], 1 }

</bundles_post_ra>
